<compile_context>
chip_gen: v6e
topology: v6e:2x2x1
jax: 0.10.0
libtpu: 0.0.40
codegen_flags: <defaults>
</compile_context>

<pallas_src>
import functools
import math

import jax
import jax.numpy as jnp
from jax.experimental import pallas as pl
from jax.experimental.pallas import tpu as pltpu

VOCAB = 32
D_MODEL = 128
SEQ = 8
BATCH = 2
N_SEG = 3


# ----------------------------- kernel --------------------------------------


def _bert_embedding_kernel(hot_ref, table_ref, o_ref, *, tok_scale):
    # hot_ref   : (rows, 3) int32  -- hot columns per output row:
    #             [token_id, V + segment_id, V + 3 + position]
    # table_ref : (K, D) f32       -- [tok_emb ; seg_emb ; pos_table]
    # o_ref     : (rows, D) f32    -- lane-dense (D == 128) output slab
    rows = hot_ref.shape[0]
    n_cols = table_ref.shape[0]

    cols = jax.lax.broadcasted_iota(jnp.int32, (rows, n_cols), 1)
    hot = hot_ref[...]

    # 3-hot matrix: token column carries the 2*sqrt(d) scale, segment and
    # positional columns carry 1.0.  Column ranges are disjoint, so the sum
    # never collides.  One MXU contraction then does gather + scale + adds.
    onehot = (jnp.where(cols == hot[:, 0:1], tok_scale, 0.0)
              + jnp.where(cols == hot[:, 1:2], 1.0, 0.0)
              + jnp.where(cols == hot[:, 2:3], 1.0, 0.0))

    # TODO(synk): dropout (p=0.1, torch train mode) is stochastic; treated as
    # identity.  In-kernel pltpu.prng_seed/prng_random_bits would implement it.
    o_ref[...] = jnp.dot(onehot, table_ref[...],
                         preferred_element_type=jnp.float32,
                         precision=jax.lax.Precision.HIGHEST).astype(o_ref.dtype)


# ----------------------------- wrapper --------------------------------------


def positional_table(seq, d):
    den = jnp.exp(-jnp.arange(0, d, 2, dtype=jnp.float32) * math.log(10000.0) / d)
    pos = jnp.arange(seq, dtype=jnp.float32)[:, None]
    pe = jnp.zeros((seq, d), jnp.float32)
    pe = pe.at[:, 0::2].set(jnp.sin(pos * den))
    pe = pe.at[:, 1::2].set(jnp.cos(pos * den))
    return pe


def init_params(key):
    k1, k2 = jax.random.split(key)
    return {
        "tok_emb": jax.random.normal(k1, (VOCAB, D_MODEL), jnp.float32) * 0.02,
        "seg_emb": jax.random.normal(k2, (N_SEG, D_MODEL), jnp.float32) * 0.02,
    }


def bert_embedding_forward(params, tokens, segments):
    # tokens / segments: [S, B] int32 (PyTorch batch_first=False convention)
    S, B = tokens.shape
    V, D = params["tok_emb"].shape
    n_seg = params["seg_emb"].shape[0]
    N = S * B
    K = V + n_seg + S

    # Combined lookup table: [tok_emb ; seg_emb ; positional rows]  -> (K, D).
    table = jnp.concatenate(
        [params["tok_emb"], params["seg_emb"], positional_table(S, D)], axis=0)

    # Hot-column indices per flattened row n = s*B + b (tiny int32 host prep;
    # float activations are never reshaped or transposed on the host).
    # Out-of-range token/segment ids would yield a silent zero contribution.
    tok = tokens.reshape(N).astype(jnp.int32)
    seg = segments.reshape(N).astype(jnp.int32)
    pos = jnp.arange(N, dtype=jnp.int32) // B          # position s of row n
    hot_idx = jnp.stack([tok, V + seg, V + n_seg + pos], axis=1)     # (N, 3)

    # Row tile: whole problem at toy size (the ~0.35us per-step overhead
    # dominates), capped at 512 rows so larger S*B gets lane-dense,
    # double-buffered blocks that pipeline DMA with compute.
    row_tile = N if N <= 512 else 512
    assert N % row_tile == 0 and row_tile % 8 == 0

    out = pl.pallas_call(
        functools.partial(_bert_embedding_kernel, tok_scale=2.0 * math.sqrt(D)),
        out_shape=jax.ShapeDtypeStruct((N, D), jnp.float32),
        grid=(N // row_tile,),
        in_specs=[pl.BlockSpec((row_tile, 3), lambda i: (i, 0)),
                  pl.BlockSpec((K, D), lambda i: (0, 0))],
        out_specs=pl.BlockSpec((row_tile, D), lambda i: (i, 0)),
        # Row axis is embarrassingly parallel -> lets Mosaic shard grid steps
        # across both TensorCores on v7x (no-op on v5e/v6e, or at grid=(1,)).
        compiler_params=pltpu.CompilerParams(dimension_semantics=("parallel",)),
    )(hot_idx, table)

    # Row-major (N, D) -> (S, B, D) is a free bitcast.
    return out.reshape(S, B, D)


def bert_embedding_reference(params, tokens, segments):
    # Pure-JAX reference of the PyTorch forward (dropout == identity).
    S, B = tokens.shape
    D = params["tok_emb"].shape[1]
    my_emb = jnp.take(params["tok_emb"], tokens, axis=0) * math.sqrt(D)   # (S, B, D)
    pos = positional_table(S, D)[:, None, :]                              # (S, 1, D)
    seg_e = jnp.take(params["seg_emb"], segments, axis=0)                 # (S, B, D)
    return my_emb + (my_emb + pos) + seg_e


if __name__ == "__main__":
    key = jax.random.PRNGKey(0)
    pk, tk, sk = jax.random.split(key, 3)
    params = init_params(pk)

    tokens = jax.random.randint(tk, (SEQ, BATCH), 0, VOCAB, dtype=jnp.int32)
    segments = jax.random.randint(sk, (SEQ, BATCH), 0, N_SEG, dtype=jnp.int32)

    x = jax.jit(bert_embedding_forward)(params, tokens, segments)
    jax.block_until_ready(x)

    ref = bert_embedding_reference(params, tokens, segments)
    assert x.shape == (SEQ, BATCH, D_MODEL)
    assert bool(jnp.all(jnp.isfinite(x)))
    # One-hot f32 gather at HIGHEST matmul precision selects exact table rows,
    # so the kernel should match the pure-JAX reference to ~1e-6.
    err = float(jnp.max(jnp.abs(x - ref)))
    assert err < 1e-5, err
    print("KERNEL_OK")
</pallas_src>

<mosaic_0001>
module attributes {stable_mosaic.version = 11 : i64} {
  func.func @_bert_embedding_kernel(%arg0: i32, %arg1: memref<16x3xi32, #tpu.memory_space<vmem>>, %arg2: memref<43x128xf32, #tpu.memory_space<vmem>>, %arg3: memref<16x128xf32, #tpu.memory_space<vmem>>) attributes {dimension_semantics = [#tpu.dimension_semantics<parallel>], iteration_bounds = array<i64: 1>, scalar_prefetch = 0 : i64, scratch_operands = 0 : i64, tpu.core_type = #tpu.core_type<tc>, window_params = [{transform_indices = @transform_0, window_bounds = array<i64: 16, 3>}, {pipeline_mode = #tpu.pipeline_mode<synchronous>, transform_indices = @transform_1, window_bounds = array<i64: 43, 128>}, {transform_indices = @transform_2, window_bounds = array<i64: 16, 128>}]} {
    %0 = tpu.iota {dimensions = array<i32: 1>} : vector<16x43xi32>
    %c0 = arith.constant 0 : index
    %c0_0 = arith.constant 0 : index
    %1 = vector.load %arg1[%c0, %c0_0] : memref<16x3xi32, #tpu.memory_space<vmem>>, vector<16x3xi32>
    %2 = vector.extract_strided_slice %1 {offsets = [0, 0], sizes = [16, 1], strides = [1, 1]} : vector<16x3xi32> to vector<16x1xi32>
    %3 = vector.broadcast %2 : vector<16x1xi32> to vector<16x43xi32>
    %4 = arith.cmpi eq, %0, %3 : vector<16x43xi32>
    %cst = arith.constant 22.6274166 : f32
    %cst_1 = arith.constant 0.000000e+00 : f32
    %5 = vector.broadcast %cst : f32 to vector<16x43xf32>
    %6 = vector.broadcast %cst_1 : f32 to vector<16x43xf32>
    %7 = arith.select %4, %5, %6 : vector<16x43xi1>, vector<16x43xf32>
    %8 = vector.extract_strided_slice %1 {offsets = [0, 1], sizes = [16, 1], strides = [1, 1]} : vector<16x3xi32> to vector<16x1xi32>
    %9 = vector.broadcast %8 : vector<16x1xi32> to vector<16x43xi32>
    %10 = arith.cmpi eq, %0, %9 : vector<16x43xi32>
    %cst_2 = arith.constant 1.000000e+00 : f32
    %cst_3 = arith.constant 0.000000e+00 : f32
    %11 = vector.broadcast %cst_2 : f32 to vector<16x43xf32>
    %12 = vector.broadcast %cst_3 : f32 to vector<16x43xf32>
    %13 = arith.select %10, %11, %12 : vector<16x43xi1>, vector<16x43xf32>
    %14 = arith.addf %7, %13 : vector<16x43xf32>
    %15 = vector.extract_strided_slice %1 {offsets = [0, 2], sizes = [16, 1], strides = [1, 1]} : vector<16x3xi32> to vector<16x1xi32>
    %16 = vector.broadcast %15 : vector<16x1xi32> to vector<16x43xi32>
    %17 = arith.cmpi eq, %0, %16 : vector<16x43xi32>
    %cst_4 = arith.constant 1.000000e+00 : f32
    %cst_5 = arith.constant 0.000000e+00 : f32
    %18 = vector.broadcast %cst_4 : f32 to vector<16x43xf32>
    %19 = vector.broadcast %cst_5 : f32 to vector<16x43xf32>
    %20 = arith.select %17, %18, %19 : vector<16x43xi1>, vector<16x43xf32>
    %21 = arith.addf %14, %20 : vector<16x43xf32>
    %c0_6 = arith.constant 0 : index
    %c0_7 = arith.constant 0 : index
    %22 = vector.load %arg2[%c0_6, %c0_7] : memref<43x128xf32, #tpu.memory_space<vmem>>, vector<43x128xf32>
    %cst_8 = arith.constant dense<0.000000e+00> : vector<16x128xf32>
    %23 = tpu.matmul %21, %22, %cst_8 {dimension_numbers = #tpu.dot_dimension_numbers<[1], [0], [0], [1], [0, 0, 1, 1], [], []>, precision = #tpu.contract_precision<fp32>} : vector<16x43xf32>, vector<43x128xf32>, vector<16x128xf32> -> vector<16x128xf32>
    %c0_9 = arith.constant 0 : index
    %c0_10 = arith.constant 0 : index
    %24 = vector.load %arg3[%c0_9, %c0_10] : memref<16x128xf32, #tpu.memory_space<vmem>>, vector<16x128xf32>
    tpu.vector_store %arg3[%c0_9, %c0_10], %23 {strides = array<i32>} : memref<16x128xf32, #tpu.memory_space<vmem>>, vector<16x128xf32>,
    return
  }
  func.func @transform_0(%arg0: i32) -> (i32, i32) {
    %c0_i32 = arith.constant 0 : i32
    %c0_i32_0 = arith.constant 0 : i32
    return %arg0, %c0_i32 : i32, i32
  }
  func.func @transform_1(%arg0: i32) -> (i32, i32) {
    %c0_i32 = arith.constant 0 : i32
    %c0_i32_0 = arith.constant 0 : i32
    %c0_i32_1 = arith.constant 0 : i32
    return %c0_i32, %c0_i32_0 : i32, i32
  }
  func.func @transform_2(%arg0: i32) -> (i32, i32) {
    %c0_i32 = arith.constant 0 : i32
    %c0_i32_0 = arith.constant 0 : i32
    return %arg0, %c0_i32 : i32, i32
  }
}

</mosaic_0001>

<bundles_post_ra>
// kernel: bert_embedding_forward.1
= control target key start
LH: loop header
LB: loop body
LE: loop exit
PB: predicated region body
PF: predicated region fallthrough
CT: control target
= control target key end

     0   :  { %v812_v2 = vmov 0   ;;  %vm63_vm0 = vcmask 1042432   ;;  %s987_s0 = inlined_call_operand.vmem [shape: s32[16,3], index: 0, kind: input, shape index: {}]   ;;  %s988_s1 = inlined_call_operand.vmem [shape: f32[43,128], index: 1, kind: input, shape index: {}]   ;;  %s989_s2 = inlined_call_operand.hbm [shape: f32[16,128], index: 2, kind: output, shape index: {}]  }
   0x1   :  { %v15_v0 = vld [vmem:[%s987_s0 + $0x8] sm:$0xff]  ;;  %v14_v1 = vld [vmem:[%s987_s0] sm:$0xff]  ;;  %786 = vset.pattern.permute.xlu1 %v812_v2  ;;  %784 = vset.pattern.permute.xlu0 %v812_v2  ;;  %v53_v5 = vld [vmem:[%s988_s1 + $0x18] sm:$0xff] }
   0x2   :  { %v55_v3 = vld [vmem:[%s988_s1 + $0x28] sm:$0x7]  ;;  %v54_v4 = vld [vmem:[%s988_s1 + $0x20] sm:$0xff]  ;;  %20 = vperm.xlu1 %786, %v15_v0   ;;  %17 = vperm.xlu0 %784, %v14_v1   ;;  %v851_v8 = vand.u32 4294901760, %v53_v5  ;;  %v52_v9 = vld [vmem:[%s988_s1 + $0x10] sm:$0xff] }
   0x3   :  { %v65_v6 = vsel %vm63_vm0, %v55_v3, 0  ;;  %v849_v7 = vand.u32 4294901760, %v54_v4  ;;  %v51_v10 = vld [vmem:[%s988_s1 + $0x8] sm:$0xff]  ;;  %v50_v11 = vld [vmem:[%s988_s1] sm:$0xff]  ;;  %v864_v13 = vand.u32 4294901760, %v52_v9 }
   0x4   :  { %v862_v12 = vand.u32 4294901760, %v65_v6  ;;  %v866_v14 = vand.u32 4294901760, %v51_v10 }
   0x5   :  { %7 = vsyncpa [#allocation3], 0  ;;  %v869_v15 = vsub.f32 %v54_v4, %v849_v7  ;;  %v872_v16 = vsub.f32 %v53_v5, %v851_v8  ;;  %v874_v17 = vand.u32 4294901760, %v50_v11  ;;  %v880_v19 = vsub.f32 %v52_v9, %v864_v13  ;;  %s816_s1 = smov [#allocation2]  }
   0x6   :  { %v877_v18 = vsub.f32 %v65_v6, %v862_v12  ;;  %687 = vmatprep.subr.mxu0 %v862_v12  ;;  %v884_v20 = vsub.f32 %v51_v10, %v866_v14  ;;  %v813_v21 = vmov 1   ;;  %v814_v31 = vmov 2   ;;  %s628_s24 = sshll.u32 %s816_s1, 4  ;;  %s629_s24 = int_to_ptr.vmem [resolvable:$true] %s628_s24 }
   0x7   :  { %787 = vset.pattern.permute.xlu1 %v813_v21  ;;  %785 = vset.pattern.permute.xlu0 %v813_v21  ;;  %v887_v22 = vand.u32 4294901760, %v869_v15  ;;  %v890_v23 = vand.u32 4294901760, %v872_v16  ;;  %v896_v25 = vand.u32 4294901760, %v880_v19  ;;  %v899_v26 = vsub.f32 %v50_v11, %v874_v17  ;;  %s790_s25 = scalar_lea.vmem %s629_s24, 256  ;;  %p795_p1 = scmp.lt.s32.totalorder %s629_s24, %s629_s24 }
   0x8   :  { %30 = vperm.xlu1 %787, %v15_v0   ;;  %27 = vperm.xlu0 %785, %v14_v1   ;;  %v893_v24 = vand.u32 4294901760, %v877_v18  ;;  %v909_v30 = vand.u32 4294901760, %v884_v20  ;;  %v12_v42 = vlaneseq  ;;  %v815_v48 = vmov 0.0   ;;  %p791_p0 = scmp.ne.s32.totalorder %s629_s24, %s790_s25  ;;  %p796_p2 = scmp.lt.s32.totalorder %s790_s25, %s790_s25 }
   0x9   :  { %v189_v27 = vsub.f32 %v869_v15, %v887_v22  ;;  %688 = vmatpush3.msra.mxu0 %v862_v12  ;;  %v196_v29 = vsub.f32 %v872_v16, %v890_v23  ;;  %v203_v34 = vsub.f32 %v880_v19, %v896_v25  ;;  %v916_v35 = vand.u32 4294901760, %v899_v26 }
   0xa   :  { %v182_v28 = vsub.f32 %v877_v18, %v893_v24  ;;  %689 = vmatprep.subr.mxu0 %v849_v7  ;;  %v210_v37 = vsub.f32 %v884_v20, %v909_v30  ;;  %v13_v45 = vand.u32 127, %v12_v42  ;;  %vm56_vm7 = vcmask 351232   ;;  %p797_p3 = por %p796_p2, %p795_p1 }
   0xb   :  { %690 = vmatpush3.msra.mxu0 %v849_v7  ;;  %v190_v33 = vand.u32 4294901760, %v189_v27  ;;  %v197_v36 = vand.u32 4294901760, %v196_v29  ;;  %v204_v38 = vand.u32 4294901760, %v203_v34  ;;  %v217_v39 = vsub.f32 %v899_v26, %v916_v35 }
   0xc   :  { %788 = vset.pattern.permute.xlu1 %v814_v31  ;;  %789 = vset.pattern.permute.xlu0 %v814_v31  ;;  %v183_v32 = vand.u32 4294901760, %v182_v28  ;;  %v211_v40 = vand.u32 4294901760, %v210_v37  ;;  %p798_p4 = pnand %p797_p3, %p791_p0 }
   0xd   :  { %39 = vperm.xlu1 %788, %v14_v1   ;;  %42 = vperm.xlu0 %789, %v15_v0   ;;  %v218_v41 = vand.u32 4294901760, %v217_v39 }
   0xe   :  { %702 = vmatprep.subr.mxu1 %v183_v32  ;;  %691 = vmatprep.subr.mxu0 %v851_v8 }
   0xf   :  { %703 = vmatpush3.msra.mxu1 %v183_v32  ;;  %692 = vmatpush3.msra.mxu0 %v851_v8 }
  0x10   :  { %704 = vmatprep.subr.mxu1 %v190_v33  ;;  %693 = vmatprep.subr.mxu0 %v864_v13 }
  0x11   :  { %705 = vmatpush3.msra.mxu1 %v190_v33  ;;  %694 = vmatpush3.msra.mxu0 %v864_v13 }
  0x12   :  { %706 = vmatprep.subr.mxu1 %v197_v36  ;;  %695 = vmatprep.subr.mxu0 %v866_v14 }
  0x13   :  { %707 = vmatpush3.msra.mxu1 %v197_v36  ;;  %696 = vmatpush3.msra.mxu0 %v866_v14 }
  0x14   :  { %708 = vmatprep.subr.mxu1 %v204_v38  ;;  %697 = vmatprep.subr.mxu0 %v874_v17 }
  0x15   :  { %709 = vmatpush3.msra.mxu1 %v204_v38  ;;  %698 = vmatpush3.msra.mxu0 %v874_v17 }
  0x16   :  { %710 = vmatprep.subr.mxu1 %v211_v40  ;;  %717 = vmatprep.subr.mxu0 %v877_v18 }
  0x17   :  { %711 = vmatpush3.msra.mxu1 %v211_v40 }
  0x18   :  { %712 = vmatprep.subr.mxu1 %v218_v41 }
  0x19   :  { %713 = vmatpush3.msra.mxu1 %v218_v41 }
  0x1a   :  { %732 = vmatprep.subr.mxu1 %v862_v12 }
  0x7d   :  { %v21_v43 = vpop.permute.xlu1 %20  ;;  %v18_v44 = vpop.permute.xlu0 %17 }
  0x7e   :  { %vm23_vm3 = vcmp.eq.s32.totalorder %v13_v45, %v21_v43  ;;  %vm22_vm4 = vcmp.eq.s32.totalorder %v13_v45, %v18_v44 }
  0x7f   :  { %v25_v51 = vsel %vm23_vm3, 22.627417, %v815_v48  ;;  %v24_v52 = vsel %vm22_vm4, 22.627417, %v815_v48 }
  0x83   :  { %v31_v46 = vpop.permute.xlu1 %30  ;;  %v28_v47 = vpop.permute.xlu0 %27 }
  0x84   :  { %vm33_vm1 = vcmp.eq.s32.totalorder %v13_v45, %v31_v46  ;;  %vm32_vm2 = vcmp.eq.s32.totalorder %v13_v45, %v28_v47 }
  0x85   :  { %v35_v49 = vsel %vm33_vm1, 1.0, %v815_v48  ;;  %v34_v50 = vsel %vm32_vm2, 1.0, %v815_v48 }
  0x86   :  { %v37_v55 = vadd.f32 %v35_v49, %v25_v51  ;;  %v36_v56 = vadd.f32 %v34_v50, %v24_v52 }
  0x88   :  { %v40_v53 = vpop.permute.xlu1 %39  ;;  %v43_v54 = vpop.permute.xlu0 %42 }
  0x89   :  { %vm44_vm5 = vcmp.eq.s32.totalorder %v13_v45, %v40_v53  ;;  %vm45_vm6 = vcmp.eq.s32.totalorder %v13_v45, %v43_v54 }
  0x8a   :  { %v46_v57 = vsel %vm44_vm5, 1.0, %v815_v48  ;;  %v47_v58 = vsel %vm45_vm6, 1.0, %v815_v48 }
  0x8b   :  { %v48_v59 = vadd.f32 %v46_v57, %v36_v56  ;;  %v49_v60 = vadd.f32 %v47_v58, %v37_v55 }
  0x8d   :  { %v58_v61 = vsel %vm56_vm7, %v48_v59, 0  ;;  %v61_v62 = vsel %vm56_vm7, %v49_v60, 0 }
  0x8e   :  { %v138_v63 = vand.u32 4294901760, %v58_v61  ;;  %v932_v0 = vand.u32 4294901760, %v61_v62 }
  0x90   :  { %v139_v1 = vsub.f32 %v58_v61, %v138_v63  ;;  %v149_v2 = vsub.f32 %v61_v62, %v932_v0  ;;  %714 = vmatprep.mubr.f32.mxu1 %v138_v63 }
  0x91   :  { %715 = vmatmul.mubr.f32.vlgmr.msra.gmra.mxu1 %v932_v0 }
  0x92   :  { %733 = vmatpush3.msra.mxu1 %v862_v12  ;;  %v140_v3 = vand.u32 4294901760, %v139_v1  ;;  %v150_v4 = vand.u32 4294901760, %v149_v2 }
  0x93   :  { %734 = vmatprep.subr.mxu1 %v849_v7 }
  0x94   :  { %735 = vmatpush3.msra.mxu1 %v849_v7  ;;  %744 = vmatprep.mubr.f32.mxu1 %v140_v3  ;;  %v141_v5 = vsub.f32 %v139_v1, %v140_v3  ;;  %v151_v6 = vsub.f32 %v149_v2, %v150_v4 }
  0x95   :  { %736 = vmatprep.subr.mxu1 %v851_v8 }
  0x96   :  { %737 = vmatpush3.msra.mxu1 %v851_v8  ;;  %v142_v9 = vand.u32 4294901760, %v141_v5  ;;  %v152_v10 = vand.u32 4294901760, %v151_v6 }
  0x97   :  { %738 = vmatprep.subr.mxu1 %v864_v13 }
  0x98   :  { %739 = vmatpush3.msra.mxu1 %v864_v13  ;;  %699 = vmatprep.mubr.f32.mxu0 %v142_v9 }
  0x99   :  { %740 = vmatprep.subr.mxu1 %v866_v14  ;;  %700 = vmatmul.mubr.f32.vlgmr.msra.gmra.mxu0 %v152_v10 }
  0x9a   :  { %718 = vmatpush3.msra.mxu0 %v877_v18  ;;  %741 = vmatpush3.msra.mxu1 %v866_v14 }
  0x9b   :  { %719 = vmatprep.subr.mxu0 %v869_v15  ;;  %729 = vmatprep.mubr.f32.mxu0 %v139_v1 }
  0x9c   :  { %742 = vmatprep.subr.mxu1 %v874_v17  ;;  %720 = vmatpush3.msra.mxu0 %v869_v15 }
  0x9d   :  { %743 = vmatpush3.msra.mxu1 %v874_v17  ;;  %721 = vmatprep.subr.mxu0 %v872_v16 }
  0x9e   :  { %745 = vmatmul.mubr.f32.vlgmr.msra.gmra.mxu1 %v150_v4  ;;  %762 = vmatprep.subr.mxu1 %v862_v12 }
  0x9f   :  { %722 = vmatpush3.msra.mxu0 %v872_v16  ;;  %763 = vmatpush3.msra.mxu1 %v862_v12 }
  0xa0   :  { %774 = vmatprep.mubr.f32.mxu1 %v138_v63  ;;  %723 = vmatprep.subr.mxu0 %v880_v19 }
  0xa1   :  { %764 = vmatprep.subr.mxu1 %v849_v7  ;;  %724 = vmatpush3.msra.mxu0 %v880_v19 }
  0xa2   :  { %765 = vmatpush3.msra.mxu1 %v849_v7  ;;  %725 = vmatprep.subr.mxu0 %v884_v20 }
  0xa3   :  { %766 = vmatprep.subr.mxu1 %v851_v8  ;;  %726 = vmatpush3.msra.mxu0 %v884_v20 }
  0xa4   :  { %767 = vmatpush3.msra.mxu1 %v851_v8  ;;  %727 = vmatprep.subr.mxu0 %v899_v26 }
  0xa5   :  { %768 = vmatprep.subr.mxu1 %v864_v13  ;;  %728 = vmatpush3.msra.mxu0 %v899_v26 }
  0xa6   :  { %769 = vmatpush3.msra.mxu1 %v864_v13  ;;  %730 = vmatmul.mubr.f32.vlgmr.msra.gmra.mxu0 %v149_v2 }
  0xa7   :  { %747 = vmatprep.subr.mxu0 %v893_v24  ;;  %770 = vmatprep.subr.mxu1 %v866_v14 }
  0xa8   :  { %748 = vmatpush3.msra.mxu0 %v893_v24  ;;  %759 = vmatprep.mubr.f32.mxu0 %v138_v63 }
  0xa9   :  { %771 = vmatpush3.msra.mxu1 %v866_v14  ;;  %749 = vmatprep.subr.mxu0 %v887_v22 }
  0xaa   :  { %772 = vmatprep.subr.mxu1 %v874_v17  ;;  %750 = vmatpush3.msra.mxu0 %v887_v22 }
  0xab   :  { %773 = vmatpush3.msra.mxu1 %v874_v17  ;;  %751 = vmatprep.subr.mxu0 %v890_v23 }
  0xac   :  { %775 = vmatmul.mubr.f32.vlgmr.msra.gmra.mxu1 %v932_v0  ;;  %752 = vmatpush3.msra.mxu0 %v890_v23 }
  0xad   :  { %753 = vmatprep.subr.mxu0 %v896_v25 }
  0xae   :  { %754 = vmatpush3.msra.mxu0 %v896_v25 }
  0xaf   :  { %755 = vmatprep.subr.mxu0 %v909_v30 }
  0xb0   :  { %756 = vmatpush3.msra.mxu0 %v909_v30 }
  0xb1   :  { %757 = vmatprep.subr.mxu0 %v916_v35 }
  0xb2   :  { %758 = vmatpush3.msra.mxu0 %v916_v35 }
  0xb3   :  { %760 = vmatmul.mubr.f32.vlgmr.msra.gmra.mxu0 %v932_v0 }
 0x151   :  { %v716_v8 = vpop.f32.mrf.mxu1 }
 0x153   :  { %v255_v13 = vpop.f32.mrf.mxu1 }
 0x159   :  { %v701_v7 = vpop.f32.mrf.mxu0 }
 0x15a   :  { %v262_v14 = vadd.f32 %v716_v8, %v701_v7 }
 0x15b   :  { %v144_v11 = vpop.f32.mrf.mxu0 }
 0x15c   :  { %v256_v17 = vadd.f32 %v255_v13, %v144_v11 }
 0x15e   :  { %v746_v15 = vpop.f32.mrf.mxu1 }
 0x160   :  { %v431_v20 = vpop.f32.mrf.mxu1 }
 0x166   :  { %v731_v12 = vpop.f32.mrf.mxu0 }
 0x167   :  { %v353_v18 = vadd.f32 %v731_v12, %v262_v14 }
 0x168   :  { %v345_v16 = vpop.f32.mrf.mxu0 }
 0x169   :  { %v346_v19 = vadd.f32 %v345_v16, %v256_v17  ;;  %v440_v21 = vadd.f32 %v746_v15, %v353_v18 }
 0x16b   :  { %v432_v25 = vadd.f32 %v431_v20, %v346_v19 }
 0x16c   :  { %v776_v22 = vpop.f32.mrf.mxu1 }
 0x16e   :  { %v611_v29 = vpop.f32.mrf.mxu1 }
 0x173   :  { %v761_v23 = vpop.f32.mrf.mxu0 }
 0x174   :  { %v535_v24 = vadd.f32 %v761_v23, %v440_v21 }
 0x175   :  { %v528_v26 = vpop.f32.mrf.mxu0 }
 0x176   :  { %v618_v27 = vadd.f32 %v776_v22, %v535_v24  ;;  %v529_v28 = vadd.f32 %v528_v26, %v432_v25 }
 0x178   :  { %622 = vst [vmem:[#allocation2 + $0x8] sm:$0xff] %v618_v27  ;;  %v612_v30 = vadd.f32 %v611_v29, %v529_v28 }
 0x17a   :  { %621 = vst [vmem:[#allocation2] sm:$0xff] %v612_v30 }
 0x17b   :  { %801 = shalt.err (!%p798_p4)
}
 0x17c   :  { %s817_s26 = smov 128   ;;  %s818_s27 = smov 8  }
 0x17d   :  { %634 = dma.vmem_to_hbm [thread:$0]  %s629_s24, 256, %s989_s2, [#allocation3], %s817_s26, %s817_s26, %s818_s27  }
 0x17e   :  { %810 = dma.done.wait [#allocation3], 256  }
 0x17f   :  { %811 = vsyncadd [#allocation3], 4294967040 }
 0x180   :  { %638 = vsyncpa [#allocation3], 1 }

</bundles_post_ra>
